<compile_context>
chip_gen: v5e
topology: v5e:2x2
jax: 0.10.0
libtpu: 0.0.40
codegen_flags: <defaults>
</compile_context>

<pallas_src>
import jax
import jax.numpy as jnp
from jax.experimental import pallas as pl
from jax.experimental.pallas import tpu as pltpu


_S_CHUNK = 256          # sequence slab per inner step (keeps intermediates small)
_NEG_BIG = -1e30        # additive mask bias for padded / masked positions


def attention_kernel(hp_ref, enc_ref, bias_ref, we_ref, v_ref, out_ref, scores_ref):
    tb, s, h2 = enc_ref.shape               # (TB, S, 2H)  -- original dtype (f32)
    h = we_ref.shape[1]

    hp = hp_ref[...][:, None, :]             # (TB, 1, H) f32, hoisted out of the loop
    we = we_ref[...]                          # (2H, H) bf16
    v_col = v_ref[...]                        # (H, 1)  bf16

    # ---- scores, one S-slab at a time (bounds e_proj/energy VMEM footprint) ----
    for c0 in range(0, s, _S_CHUNK):
        cs = min(_S_CHUNK, s - c0)
        enc_c = enc_ref[:, c0:c0 + cs, :].astype(jnp.bfloat16)          # cast in-kernel
        # e_proj = enc @ We^T : one tall-M MXU matmul (M = TB*cs)
        e_proj = jnp.dot(enc_c.reshape(tb * cs, h2), we,
                         preferred_element_type=jnp.float32)            # (TB*cs, H) f32
        # energy = tanh(e_proj + h_proj) ; bf16 tanh keeps the lone EUP slot hidden
        energy = jnp.tanh((e_proj.reshape(tb, cs, h) + hp).astype(jnp.bfloat16))
        # scores = energy . v : single flattened matmul, one narrow relayout
        sc = jnp.dot(energy.reshape(tb * cs, h), v_col,
                     preferred_element_type=jnp.float32)                # (TB*cs, 1)
        scores_ref[:, c0:c0 + cs] = sc.reshape(tb, cs)

    # ---- masked softmax over the (lane-dense) sequence axis, all f32 ----
    scores = scores_ref[...] + bias_ref[...]          # bias: 0 valid / -1e30 masked
    mx = jnp.max(scores, axis=-1, keepdims=True)
    ex = jnp.exp(scores - mx)
    denom = jnp.sum(ex, axis=-1, keepdims=True)
    out_ref[...] = ex / denom                          # exact divide: rows sum to 1


def _choose_tb(B, S, H2):
    """Batch-block size: ~8 MiB f32 encoder block per pipeline buffer."""
    per_row = S * H2 * 4                              # f32 bytes per batch row of enc
    tb = (8 * 1024 * 1024) // max(per_row, 1)
    tb = max(8, min(512, (tb // 8) * 8))              # multiple of 8 (sublane rule)
    if B > 1:
        # keep >= 2 grid steps where possible so both v7x TensorCores get work
        tb = min(tb, pl.cdiv(pl.cdiv(B, 2), 8) * 8)
    if tb >= B:
        return B                                      # single full-extent block
    return tb


def pgn_attention(hidden, encoder_outputs, mask, W, b, v):
    """hidden (B,H), encoder_outputs (B,S,2H), mask (B,S), W (H,3H), b (H,), v (H,)."""
    B, S, H2 = encoder_outputs.shape
    H = hidden.shape[1]
    assert H2 == 2 * H and W.shape == (H, 3 * H)

    # Split cat([hidden, enc]) @ W^T; hoist the M=1 hidden projection to XLA.
    W = jnp.asarray(W, jnp.float32)
    wh_t = W[:, :H].T                                              # (H, H)  f32
    we_t = W[:, H:].T.astype(jnp.bfloat16)                         # (2H, H) bf16 (tiny)
    hp = jnp.asarray(hidden, jnp.float32) @ wh_t + jnp.asarray(b, jnp.float32)[None, :]
    v_col = jnp.asarray(v, jnp.bfloat16).reshape(H, 1)

    # Additive mask bias (small (B,S) array; avoids int compares in the kernel).
    bias = jnp.where(mask != 0, 0.0, _NEG_BIG).astype(jnp.float32)

    tb = _choose_tb(B, S, H2)
    grid_b = pl.cdiv(B, tb)       # partial tail block: rows never mix, writes cropped

    out = pl.pallas_call(
        attention_kernel,
        out_shape=jax.ShapeDtypeStruct((B, S), jnp.float32),
        grid=(grid_b,),
        in_specs=[
            pl.BlockSpec((tb, H), lambda i: (i, 0)),           # h_proj (f32)
            pl.BlockSpec((tb, S, H2), lambda i: (i, 0, 0)),    # encoder_outputs (as-is)
            pl.BlockSpec((tb, S), lambda i: (i, 0)),           # additive mask bias
            pl.BlockSpec((H2, H), lambda i: (0, 0)),           # We^T (bf16)
            pl.BlockSpec((H, 1), lambda i: (0, 0)),            # v (bf16 column)
        ],
        out_specs=pl.BlockSpec((tb, S), lambda i: (i, 0)),
        scratch_shapes=[pltpu.VMEM((tb, S), jnp.float32)],     # scores scratch
        compiler_params=pltpu.CompilerParams(
            dimension_semantics=("parallel",),
            vmem_limit_bytes=48 * 1024 * 1024,
        ),
    )(hp, encoder_outputs, bias, we_t, v_col)
    return out


def reference(hidden, enc, mask, W, b, v):
    """Pure-JAX f32 mirror of the PyTorch forward, for correctness checking."""
    B, S, _ = enc.shape
    h_rep = jnp.repeat(hidden[:, None, :], S, axis=1)
    cat = jnp.concatenate([h_rep, enc], axis=2)                  # (B, S, 3H)
    energy = jnp.tanh(cat @ W.T + b)                             # (B, S, H)
    scores = jnp.einsum("h,bsh->bs", v, energy)                  # (B, S)
    scores = jnp.where(mask == 0, -jnp.inf, scores)
    return jax.nn.softmax(scores, axis=1)


if __name__ == "__main__":
    B, S, H = 2, 8, 32
    key = jax.random.PRNGKey(0)
    k_h, k_e, k_w, k_b, k_v = jax.random.split(key, 5)

    hidden = jax.random.normal(k_h, (B, H), jnp.float32)
    encoder_outputs = jax.random.normal(k_e, (B, S, 2 * H), jnp.float32)

    # mask: batch 0 fully valid, batch 1 has last 3 positions padded
    mask = jnp.array([[1] * S, [1] * (S - 3) + [0] * 3], dtype=jnp.int32)

    # Deterministic parameter init (nn.Linear(3H, H) and v ~ rand(H))
    bound = 1.0 / jnp.sqrt(3.0 * H)
    W = jax.random.uniform(k_w, (H, 3 * H), jnp.float32, -bound, bound)
    b = jax.random.uniform(k_b, (H,), jnp.float32, -bound, bound)
    v = jax.random.uniform(k_v, (H,), jnp.float32, 0.0, 1.0)

    out = jax.block_until_ready(pgn_attention(hidden, encoder_outputs, mask, W, b, v))
    ref = reference(hidden, encoder_outputs, mask, W, b, v)

    assert out.shape == (B, S)
    assert bool(jnp.all(jnp.isfinite(out)))
    # bf16 enc/We/energy/v in the kernel vs. exact f32 reference -> loose tolerance
    assert jnp.allclose(out, ref, atol=3e-2, rtol=3e-2), (out, ref)
    # masked positions get exactly zero weight
    assert bool(jnp.all(out[1, S - 3:] == 0.0))
    # exact softmax divide -> rows sum to 1 up to f32 rounding
    assert jnp.allclose(out.sum(axis=1), jnp.ones((B,)), atol=1e-4)

    print("KERNEL_OK")
</pallas_src>

<mosaic_0001>
module attributes {stable_mosaic.version = 11 : i64} {
  func.func @attention_kernel(%arg0: i32, %arg1: memref<2x32xf32, #tpu.memory_space<vmem>>, %arg2: memref<2x8x64xf32, #tpu.memory_space<vmem>>, %arg3: memref<2x8xf32, #tpu.memory_space<vmem>>, %arg4: memref<64x32xbf16, #tpu.memory_space<vmem>>, %arg5: memref<32x1xbf16, #tpu.memory_space<vmem>>, %arg6: memref<2x8xf32, #tpu.memory_space<vmem>>, %arg7: memref<2x8xf32, #tpu.memory_space<vmem>>) attributes {dimension_semantics = [#tpu.dimension_semantics<parallel>], iteration_bounds = array<i64: 1>, scalar_prefetch = 0 : i64, scratch_operands = 1 : i64, tpu.core_type = #tpu.core_type<tc>, window_params = [{transform_indices = @transform_0, window_bounds = array<i64: 2, 32>}, {transform_indices = @transform_1, window_bounds = array<i64: 2, 8, 64>}, {transform_indices = @transform_2, window_bounds = array<i64: 2, 8>}, {pipeline_mode = #tpu.pipeline_mode<synchronous>, transform_indices = @transform_3, window_bounds = array<i64: 64, 32>}, {pipeline_mode = #tpu.pipeline_mode<synchronous>, transform_indices = @transform_4, window_bounds = array<i64: 32, 1>}, {transform_indices = @transform_5, window_bounds = array<i64: 2, 8>}]} {
    %c0 = arith.constant 0 : index
    %c0_0 = arith.constant 0 : index
    %0 = vector.load %arg1[%c0, %c0_0] : memref<2x32xf32, #tpu.memory_space<vmem>>, vector<2x32xf32>
    %1 = vector.shape_cast %0 : vector<2x32xf32> to vector<2x1x32xf32>
    %c0_1 = arith.constant 0 : index
    %c0_2 = arith.constant 0 : index
    %2 = vector.load %arg4[%c0_1, %c0_2] : memref<64x32xbf16, #tpu.memory_space<vmem>>, vector<64x32xbf16>
    %c0_3 = arith.constant 0 : index
    %c0_4 = arith.constant 0 : index
    %3 = vector.load %arg5[%c0_3, %c0_4] : memref<32x1xbf16, #tpu.memory_space<vmem>>, vector<32x1xbf16>
    %c0_5 = arith.constant 0 : index
    %c0_6 = arith.constant 0 : index
    %c0_7 = arith.constant 0 : index
    %4 = vector.load %arg2[%c0_5, %c0_6, %c0_7] : memref<2x8x64xf32, #tpu.memory_space<vmem>>, vector<2x8x64xf32>
    %5 = arith.truncf %4 : vector<2x8x64xf32> to vector<2x8x64xbf16>
    %6 = vector.shape_cast %5 : vector<2x8x64xbf16> to vector<16x64xbf16>
    %cst = arith.constant dense<0.000000e+00> : vector<16x32xf32>
    %7 = tpu.matmul %6, %2, %cst {dimension_numbers = #tpu.dot_dimension_numbers<[1], [0], [0], [1], [0, 0, 1, 1], [], []>} : vector<16x64xbf16>, vector<64x32xbf16>, vector<16x32xf32> -> vector<16x32xf32>
    %8 = vector.shape_cast %7 : vector<16x32xf32> to vector<2x8x32xf32>
    %9 = vector.broadcast %1 : vector<2x1x32xf32> to vector<2x8x32xf32>
    %10 = arith.addf %8, %9 : vector<2x8x32xf32>
    %11 = arith.truncf %10 : vector<2x8x32xf32> to vector<2x8x32xbf16>
    %12 = math.tanh %11 : vector<2x8x32xbf16>
    %13 = vector.shape_cast %12 : vector<2x8x32xbf16> to vector<16x32xbf16>
    %cst_8 = arith.constant dense<0.000000e+00> : vector<16x1xf32>
    %14 = tpu.matmul %13, %3, %cst_8 {dimension_numbers = #tpu.dot_dimension_numbers<[1], [0], [0], [1], [0, 0, 1, 1], [], []>} : vector<16x32xbf16>, vector<32x1xbf16>, vector<16x1xf32> -> vector<16x1xf32>
    %15 = vector.shape_cast %14 : vector<16x1xf32> to vector<2x8xf32>
    %c0_9 = arith.constant 0 : index
    %c0_10 = arith.constant 0 : index
    %16 = vector.load %arg7[%c0_9, %c0_10] : memref<2x8xf32, #tpu.memory_space<vmem>>, vector<2x8xf32>
    tpu.vector_store %arg7[%c0_9, %c0_10], %15 {strides = array<i32>} : memref<2x8xf32, #tpu.memory_space<vmem>>, vector<2x8xf32>,
    %c0_11 = arith.constant 0 : index
    %c0_12 = arith.constant 0 : index
    %17 = vector.load %arg7[%c0_11, %c0_12] : memref<2x8xf32, #tpu.memory_space<vmem>>, vector<2x8xf32>
    %c0_13 = arith.constant 0 : index
    %c0_14 = arith.constant 0 : index
    %18 = vector.load %arg3[%c0_13, %c0_14] : memref<2x8xf32, #tpu.memory_space<vmem>>, vector<2x8xf32>
    %19 = arith.addf %17, %18 : vector<2x8xf32>
    %cst_15 = arith.constant dense<0xFF800000> : vector<2xf32>
    %20 = vector.multi_reduction <maximumf>, %19, %cst_15 [1] : vector<2x8xf32> to vector<2xf32>
    %21 = vector.shape_cast %20 : vector<2xf32> to vector<2x1xf32>
    %22 = vector.broadcast %21 : vector<2x1xf32> to vector<2x8xf32>
    %23 = arith.subf %19, %22 : vector<2x8xf32>
    %24 = math.exp %23 : vector<2x8xf32>
    %cst_16 = arith.constant dense<0.000000e+00> : vector<2xf32>
    %25 = vector.multi_reduction <add>, %24, %cst_16 [1] : vector<2x8xf32> to vector<2xf32>
    %26 = vector.shape_cast %25 : vector<2xf32> to vector<2x1xf32>
    %27 = vector.broadcast %26 : vector<2x1xf32> to vector<2x8xf32>
    %28 = arith.divf %24, %27 : vector<2x8xf32>
    %c0_17 = arith.constant 0 : index
    %c0_18 = arith.constant 0 : index
    %29 = vector.load %arg6[%c0_17, %c0_18] : memref<2x8xf32, #tpu.memory_space<vmem>>, vector<2x8xf32>
    tpu.vector_store %arg6[%c0_17, %c0_18], %28 {strides = array<i32>} : memref<2x8xf32, #tpu.memory_space<vmem>>, vector<2x8xf32>,
    return
  }
  func.func @transform_0(%arg0: i32) -> (i32, i32) {
    %c0_i32 = arith.constant 0 : i32
    %c0_i32_0 = arith.constant 0 : i32
    return %arg0, %c0_i32 : i32, i32
  }
  func.func @transform_1(%arg0: i32) -> (i32, i32, i32) {
    %c0_i32 = arith.constant 0 : i32
    %c0_i32_0 = arith.constant 0 : i32
    %c0_i32_1 = arith.constant 0 : i32
    return %arg0, %c0_i32, %c0_i32_0 : i32, i32, i32
  }
  func.func @transform_2(%arg0: i32) -> (i32, i32) {
    %c0_i32 = arith.constant 0 : i32
    %c0_i32_0 = arith.constant 0 : i32
    return %arg0, %c0_i32 : i32, i32
  }
  func.func @transform_3(%arg0: i32) -> (i32, i32) {
    %c0_i32 = arith.constant 0 : i32
    %c0_i32_0 = arith.constant 0 : i32
    %c0_i32_1 = arith.constant 0 : i32
    return %c0_i32, %c0_i32_0 : i32, i32
  }
  func.func @transform_4(%arg0: i32) -> (i32, i32) {
    %c0_i32 = arith.constant 0 : i32
    %c0_i32_0 = arith.constant 0 : i32
    %c0_i32_1 = arith.constant 0 : i32
    return %c0_i32, %c0_i32_0 : i32, i32
  }
  func.func @transform_5(%arg0: i32) -> (i32, i32) {
    %c0_i32 = arith.constant 0 : i32
    %c0_i32_0 = arith.constant 0 : i32
    return %arg0, %c0_i32 : i32, i32
  }
}

</mosaic_0001>

<bundles_post_ra>
// kernel: tpu_custom_call.1
= control target key start
LH: loop header
LB: loop body
LE: loop exit
PB: predicated region body
PF: predicated region fallthrough
CT: control target
= control target key end

     0   :  { %s336_s0 = inlined_call_operand.vmem [shape: f32[2,32], index: 0, kind: input, shape index: {}]   ;;  %s337_s1 = inlined_call_operand.vmem [shape: f32[2,8,64], index: 1, kind: input, shape index: {}]   ;;  %s338_s2 = inlined_call_operand.vmem [shape: f32[2,8], index: 2, kind: input, shape index: {}]   ;;  %s339_s3 = inlined_call_operand.vmem [shape: bf16[64,32], index: 3, kind: input, shape index: {}]   ;;  %s340_s4 = inlined_call_operand.vmem [shape: bf16[32,1], index: 4, kind: input, shape index: {}]   ;;  %s341_s5 = inlined_call_operand.hbm [shape: f32[2,8], index: 5, kind: output, shape index: {}]  }
   0x1   :  { %v227_v0 = vld [vmem:[%s339_s3 + $0x18] sm:$0xff]  ;;  %v226_v1 = vld [vmem:[%s339_s3 + $0x10] sm:$0xff]  ;;  %v37_v2 = vld [vmem:[%s337_s1] sm:$0xff] }
   0x2   :  { %78 = vmatpush.bf16.msra.mxu0 %v227_v0  ;;  %v38_v3 = vld [vmem:[%s337_s1 + $0x8] sm:$0xff] }
   0x3   :  { %10 = vsyncpa [#allocation4], 0  ;;  %v39_v4 = vpack.c.bf16 %v37_v2, %v37_v2  ;;  %v40_v5 = vpack.c.bf16 %v38_v3, %v38_v3  ;;  %v225_v6 = vld [vmem:[%s339_s3 + $0x8] sm:$0xff]  ;;  %v224_v9 = vld [vmem:[%s339_s3] sm:$0xff]  ;;  %vm70_vm0 = vcmask 523264   ;;  %v267_v15 = vmov 0  }
   0x4   :  { %v229_v11 = vld [vmem:[%s340_s4 + $0x8] sm:$0xff]  ;;  %v228_v12 = vld [vmem:[%s340_s4] sm:$0xff]  ;;  %232 = vset.pattern.permute.xlu0 %v267_v15  ;;  %vm119_vm1 = vcmask 261120   ;;  %v145_v36 = vlaneseq  ;;  %vm149_vm2 = vcmask 1041409   ;;  %vm152_vm3 = vcmask 58368   ;;  %s189_s12 = sshll.u32 %s341_s5, 4  ;;  %s190_s12 = int_to_ptr.hbm [resolvable:$true] %s189_s12 }
   0x5   :  { %v43_v7 = vunpack.c.l.b16 %v39_v4  ;;  %v44_v8 = vunpack.c.l.b16 %v40_v5  ;;  %129 = vmatpush.bf16.msra.mxu1 %v229_v11  ;;  %v22_v13 = vld [vmem:[%s336_s0] sm:$0x3] }
   0x6   :  { %79 = vmatpush.bf16.msra.mxu0 %v226_v1  ;;  %v88_v14 = vperm.slane %v22_v13, 0  ;;  %v24_v18 = vrot.slane %v22_v13, 1  ;;  %v146_v37 = vand.u32 127, %v145_v36  ;;  %v155_v42 = vld [vmem:[%s338_s2] sm:$0x3]  ;;  %s268_s2 = smov [#allocation3]  }
   0x7   :  { %v45_v10 = vpack.c.b16 %v44_v8, %v43_v7  ;;  %s187_s4 = sshll.u32 %s268_s2, 4  ;;  %s188_s4 = int_to_ptr.vmem [resolvable:$true] %s187_s4 }
   0x8   :  { %v89_v20 = vperm.slane %v24_v18, 0 }
   0x9   :  { %130 = vmatpush.bf16.msra.mxu1 %v228_v12 }
   0xa   :  { %80 = vmatpush.bf16.msra.mxu0 %v225_v6 }
   0xe   :  { %81 = vmatpush.bf16.msra.mxu0 %v224_v9 }
  0x11   :  { %214 = vmatmul.msk.bf16.vlgmr.msra.gmra.mxu0 %vm70_vm0, %v45_v10 }
  0x8e   :  { %v83_v16 = vpop.f32.mrf.mxu0 }
  0x8f   :  { %v92_v17 = vadd.f32 %v88_v14, %v83_v16 }
  0x91   :  { %v94_v19 = vpack.c.bf16 %v92_v17, %v92_v17 }
  0x93   :  { %v96_v21 = vunpack.c.l.bf16 %v94_v19 }
  0x95   :  { %233 = vtanh.f32 %v96_v21 }
  0x96   :  { %v85_v22 = vpop.f32.mrf.mxu0 }
  0x97   :  { %v93_v23 = vadd.f32 %v89_v20, %v85_v22 }
  0x99   :  { %v95_v24 = vpack.c.bf16 %v93_v23, %v93_v23 }
  0x9b   :  { %v97_v25 = vunpack.c.l.bf16 %v95_v24  ;;  %v234_v26 = vpop.eup %233 }
  0x9c   :  { %v100_v27 = vpack.c.bf16 %v234_v26, %v234_v26 }
  0x9d   :  { %235 = vtanh.f32 %v97_v25 }
  0x9e   :  { %v104_v30 = vunpack.c.l.b16 %v100_v27 }
  0xa3   :  { %v236_v28 = vpop.eup %235 }
  0xa4   :  { %v101_v29 = vpack.c.bf16 %v236_v28, %v236_v28 }
  0xa6   :  { %v105_v31 = vunpack.c.l.b16 %v101_v29 }
  0xa8   :  { %v106_v32 = vpack.c.b16 %v105_v31, %v104_v30 }
  0xaa   :  { %223 = vmatmul.msk.bf16.vlgmr.msra.gmra.mxu1 %vm119_vm1, %v106_v32 }
 0x127   :  { %v132_v33 = vpop.f32.mrf.mxu1 }
 0x128   :  { %140 = vperm.xlu0 %232, %v132_v33  }
 0x12f   :  { %v134_v34 = vpop.f32.mrf.mxu1 }
 0x130   :  { %143 = vperm.xlu0 %232, %v134_v34  }
 0x19a   :  { %v141_v35 = vpop.permute.xlu0 %140 }
 0x19b   :  { %v147_v39 = vperm.slane %v141_v35, %v146_v37 }
 0x1a2   :  { %v144_v38 = vpop.permute.xlu0 %143 }
 0x1a3   :  { %v148_v40 = vperm.slane %v144_v38, %v146_v37 }
 0x1a5   :  { %v150_v41 = vsel %vm149_vm2, %v148_v40, %v147_v39 }
 0x1a6   :  { %153 = vst.msk [vmem:[#allocation2] sm:$0x3] %vm152_vm3, %v150_v41 }
 0x1ad   :  { %v154_v43 = vld [vmem:[#allocation2] sm:$0x3] }
 0x1ae   :  { %v156_v44 = vadd.f32 %v155_v42, %v154_v43 }
 0x1b0   :  { %v157_v45 = vsel %vm152_vm3, %v156_v44, -inf }
 0x1b1   :  { %158 = vmax.xlane.f32.xlu1 %v157_v45 }
 0x224   :  { %v159_v46 = vpop.xlane.xlu1 %158 }
 0x225   :  { %v160_v47 = vsub.f32 %v156_v44, %v159_v46 }
 0x227   :  { %v161_v48 = vmul.f32 1.442695, %v160_v47 }
 0x229   :  { %237 = vpow2.f32 %v161_v48 }
 0x22f   :  { %v238_v49 = vpop.eup %237 }
 0x230   :  { %v163_v50 = vsel %vm152_vm3, %v238_v49, 0.0 }
 0x231   :  { %164 = vadd.xlane.f32.xlu1 %v163_v50 }
 0x2a4   :  { %v165_v51 = vpop.xlane.xlu1 %164 }
 0x2a5   :  { %239 = vrcp.f32 %v165_v51  ;;  %v177_v55 = vand.u32 2147483648, %v165_v51  ;;  %v175_v57 = vand.u32 2147483647, %v165_v51  ;;  %vm171_vm5 = vweird.f32 %v165_v51 }
 0x2a7   :  { %v178_v59 = vor.u32 1.1754944e-38, %v177_v55  ;;  %vm176_vm7 = vcmp.eq.f32.partialorder %v175_v57, 8.507059e+37 }
 0x2ab   :  { %v240_v52 = vpop.eup %239 }
 0x2ac   :  { %v167_v53 = vmul.f32 %v240_v52, %v165_v51  ;;  %vm172_vm4 = vweird.f32 %v240_v52 }
 0x2ad   :  { %vm173_vm6 = vmor %vm171_vm5, %vm172_vm4 }
 0x2ae   :  { %v168_v54 = vsub.f32 1.0, %v167_v53 }
 0x2b0   :  { %v169_v56 = vmul.f32 %v240_v52, %v168_v54 }
 0x2b2   :  { %v170_v58 = vadd.f32 %v240_v52, %v169_v56 }
 0x2b4   :  { %v174_v60 = vsel %vm173_vm6, %v240_v52, %v170_v58 }
 0x2b5   :  { %v179_v61 = vsel %vm176_vm7, %v178_v59, %v174_v60 }
 0x2b6   :  { %v180_v62 = vmul.f32 %v238_v49, %v179_v61 }
 0x2b8   :  { %181 = vst.msk [vmem:[#allocation3] sm:$0x3] %vm152_vm3, %v180_v62 }
 0x2b9   :  { %192 = dma.vmem_to_hbm [thread:$0]  %s188_s4, 32, %s190_s12, [#allocation4]  }
 0x2ba   :  { %265 = dma.done.wait [#allocation4], 32  }
 0x2bb   :  { %266 = vsyncadd [#allocation4], 4294967264 }
 0x2bc   :  { %197 = vsyncpa [#allocation4], 1 }

</bundles_post_ra>
